<compile_context>
chip_gen: v7x
topology: tpu7x:2x2x1
jax: 0.10.0
libtpu: 0.0.40
codegen_flags: <defaults>
</compile_context>

<pallas_src>
import functools

import jax
import jax.numpy as jnp
from jax import lax
from jax.experimental import pallas as pl
from jax.experimental.pallas import tpu as pltpu


def _round_up(x, m):
    return ((x + m - 1) // m) * m


def _rpe_gather_kernel(table_ref, iota_ref, idx_ref, out_ref):
    """Gather columns of the bias table according to idx via one-hot matmul.

    table_ref: (H, E)  f32    -- full table, resident every grid step
    iota_ref:  (E, TL) int32  -- constant column-index iota, resident
    idx_ref:   (1, TL) int32  -- tile of flattened indices
    out_ref:   (H, TL) f32    -- gathered bias tile
    """
    # one_hot[e, l] = (e == idx[l]); only the compare+convert is per-step work.
    one_hot = (iota_ref[...] == idx_ref[...]).astype(jnp.float32)   # (E, TL)
    out_ref[...] = lax.dot_general(
        table_ref[...].astype(jnp.float32),
        one_hot,
        dimension_numbers=(((1,), (0,)), ((), ())),
        preferred_element_type=jnp.float32,
        precision=lax.Precision.HIGHEST,   # keep the f32 gather exact on MXU
    ).astype(out_ref.dtype)


# Per-step byte budget for the (E, tile_l) one-hot / iota objects.  Keeps the
# intermediate in a few MiB so it fits comfortably on every generation
# (v7x physical VMEM is only 64 MiB; double-buffered idx/out need headroom).
_ONE_HOT_BUDGET_BYTES = 2 << 20


@functools.partial(jax.jit, static_argnames=("target_tile_l",))
def relative_position_2d_encoder(table, attn_rpe_index, target_tile_l=1024):
    """Pallas implementation of RelativePosition2DEncoder.forward.

    Args:
      table:           (num_heads, embed_size) float32 bias table.
      attn_rpe_index:  integer array of any shape, values in [0, embed_size).
      target_tile_l:   desired lane-tile along the flattened index axis
                       (rounded/capped internally; multiple of 128).
    Returns:
      (1, num_heads, *attn_rpe_index.shape) float32.
    """
    num_heads, embed_size = table.shape
    idx_shape = attn_rpe_index.shape
    idx_flat = attn_rpe_index.reshape(-1).astype(jnp.int32)
    L = idx_flat.shape[0]

    # ---- choose tile_l (static: depends only on shapes) -------------------
    # Cap so the (E, tile_l) one-hot intermediate stays within budget.
    cap = max(128, (_ONE_HOT_BUDGET_BYTES // (4 * embed_size)) // 128 * 128)
    tile_l = max(128, min(_round_up(target_tile_l, 128), cap))
    L_pad_min = _round_up(max(L, 1), 128)
    if L_pad_min <= tile_l:
        # Small problem: single grid step, no pipeline overhead.
        tile_l = L_pad_min
    L_pad = _round_up(max(L, 1), tile_l)
    grid = (L_pad // tile_l,)

    # ---- host-side prep (no scatter, no extra copies) ---------------------
    if L_pad != L:
        idx_padded = jnp.pad(idx_flat, (0, L_pad - L))
    else:
        idx_padded = idx_flat
    idx_padded = idx_padded.reshape(1, L_pad)

    # Constant iota, built once and held resident in VMEM (constant index_map).
    iota = lax.broadcasted_iota(jnp.int32, (embed_size, tile_l), 0)

    cost = pl.CostEstimate(
        flops=2 * num_heads * embed_size * L_pad,
        transcendentals=0,
        bytes_accessed=4 * (num_heads * embed_size        # table
                            + embed_size * tile_l          # iota (once)
                            + L_pad                        # indices
                            + num_heads * L_pad),          # output
    )

    out = pl.pallas_call(
        _rpe_gather_kernel,
        out_shape=jax.ShapeDtypeStruct((num_heads, L_pad), jnp.float32),
        grid_spec=pltpu.PrefetchScalarGridSpec(
            num_scalar_prefetch=0,
            grid=grid,
            in_specs=[
                # Full bias table each step (small: H x E), resident.
                pl.BlockSpec((num_heads, embed_size), lambda i: (0, 0)),
                # Constant iota, resident across all grid steps.
                pl.BlockSpec((embed_size, tile_l), lambda i: (0, 0)),
                # One lane-tile of indices per grid step.
                pl.BlockSpec((1, tile_l), lambda i: (0, i)),
            ],
            out_specs=pl.BlockSpec((num_heads, tile_l), lambda i: (0, i)),
        ),
        compiler_params=pltpu.CompilerParams(
            # L axis is independent -> shards across v7x's two TensorCores
            # when grid has >= 2 steps; free on v5e/v6e.
            dimension_semantics=("parallel",),
        ),
        cost_estimate=cost,
    )(table, iota, idx_padded)

    if L_pad != L:
        out = out[:, :L]                                  # drop padded lanes
    return out.reshape((1, num_heads) + idx_shape)        # (1, H, *)


def _reference(table, attn_rpe_index):
    # Pure-JAX reference of `table[:, idx].unsqueeze(0)`
    return jnp.take(table, attn_rpe_index, axis=1)[None, ...]


if __name__ == "__main__":
    num_heads = 8
    embed_size = 64

    key = jax.random.PRNGKey(0)
    k_table, k_idx1, k_idx2 = jax.random.split(key, 3)

    # trunc_normal_(std=0.02): truncated normal in [-2, 2] sigma, scaled.
    table = (jax.random.truncated_normal(
        k_table, -2.0, 2.0, (num_heads, embed_size), jnp.float32) * 0.02)

    # Case 1: typical SwinTrack-style square index map (single grid step).
    idx_shape1 = (16, 16)
    idx1 = jax.random.randint(
        k_idx1, idx_shape1, minval=0, maxval=embed_size, dtype=jnp.int32)
    out1 = jax.block_until_ready(relative_position_2d_encoder(table, idx1))
    ref1 = _reference(table, idx1)
    assert out1.shape == (1, num_heads) + idx_shape1, out1.shape
    assert jnp.allclose(out1, ref1, atol=1e-6, rtol=1e-6), "mismatch (case 1)"

    # Case 2: non-tile-aligned shape, small forced tile -> multi-step grid,
    # exercising padding + slice + the parallel L axis.
    idx_shape2 = (23, 37)
    idx2 = jax.random.randint(
        k_idx2, idx_shape2, minval=0, maxval=embed_size, dtype=jnp.int32)
    out2 = jax.block_until_ready(
        relative_position_2d_encoder(table, idx2, target_tile_l=256))
    ref2 = _reference(table, idx2)
    assert out2.shape == (1, num_heads) + idx_shape2, out2.shape
    assert jnp.allclose(out2, ref2, atol=1e-6, rtol=1e-6), "mismatch (case 2)"

    print("KERNEL_OK")
</pallas_src>

<mosaic_0001>
module attributes {stable_mosaic.version = 11 : i64} {
  func.func @_rpe_gather_kernel(%arg0: i32, %arg1: memref<8x64xf32, #tpu.memory_space<vmem>>, %arg2: memref<64x256xi32, #tpu.memory_space<vmem>>, %arg3: memref<1x256xi32, #tpu.memory_space<vmem>>, %arg4: memref<8x256xf32, #tpu.memory_space<vmem>>) attributes {dimension_semantics = [#tpu.dimension_semantics<parallel>], iteration_bounds = array<i64: 1>, scalar_prefetch = 0 : i64, scratch_operands = 0 : i64, tpu.core_type = #tpu.core_type<tc>, window_params = [{pipeline_mode = #tpu.pipeline_mode<synchronous>, transform_indices = @transform_0, window_bounds = array<i64: 8, 64>}, {pipeline_mode = #tpu.pipeline_mode<synchronous>, transform_indices = @transform_1, window_bounds = array<i64: 64, 256>}, {transform_indices = @transform_2, window_bounds = array<i64: 1, 256>}, {transform_indices = @transform_3, window_bounds = array<i64: 8, 256>}]} {
    %c0 = arith.constant 0 : index
    %c0_0 = arith.constant 0 : index
    %0 = vector.load %arg2[%c0, %c0_0] : memref<64x256xi32, #tpu.memory_space<vmem>>, vector<64x256xi32>
    %c0_1 = arith.constant 0 : index
    %c0_2 = arith.constant 0 : index
    %1 = vector.load %arg3[%c0_1, %c0_2] : memref<1x256xi32, #tpu.memory_space<vmem>>, vector<1x256xi32>
    %2 = vector.broadcast %1 : vector<1x256xi32> to vector<64x256xi32>
    %3 = arith.cmpi eq, %0, %2 : vector<64x256xi32>
    %4 = arith.extui %3 : vector<64x256xi1> to vector<64x256xi32>
    %5 = arith.sitofp %4 : vector<64x256xi32> to vector<64x256xf32>
    %c0_3 = arith.constant 0 : index
    %c0_4 = arith.constant 0 : index
    %6 = vector.load %arg1[%c0_3, %c0_4] : memref<8x64xf32, #tpu.memory_space<vmem>>, vector<8x64xf32>
    %cst = arith.constant dense<0.000000e+00> : vector<8x256xf32>
    %7 = tpu.matmul %6, %5, %cst {dimension_numbers = #tpu.dot_dimension_numbers<[1], [0], [0], [1], [0, 0, 1, 1], [], []>, precision = #tpu.contract_precision<fp32>} : vector<8x64xf32>, vector<64x256xf32>, vector<8x256xf32> -> vector<8x256xf32>
    %c0_5 = arith.constant 0 : index
    %c0_6 = arith.constant 0 : index
    %8 = vector.load %arg4[%c0_5, %c0_6] : memref<8x256xf32, #tpu.memory_space<vmem>>, vector<8x256xf32>
    tpu.vector_store %arg4[%c0_5, %c0_6], %7 {strides = array<i32>} : memref<8x256xf32, #tpu.memory_space<vmem>>, vector<8x256xf32>,
    return
  }
  func.func @transform_0(%arg0: i32) -> (i32, i32) {
    %c0_i32 = arith.constant 0 : i32
    %c0_i32_0 = arith.constant 0 : i32
    %c0_i32_1 = arith.constant 0 : i32
    return %c0_i32, %c0_i32_0 : i32, i32
  }
  func.func @transform_1(%arg0: i32) -> (i32, i32) {
    %c0_i32 = arith.constant 0 : i32
    %c0_i32_0 = arith.constant 0 : i32
    %c0_i32_1 = arith.constant 0 : i32
    return %c0_i32, %c0_i32_0 : i32, i32
  }
  func.func @transform_2(%arg0: i32) -> (i32, i32) {
    %c0_i32 = arith.constant 0 : i32
    %c0_i32_0 = arith.constant 0 : i32
    return %c0_i32, %arg0 : i32, i32
  }
  func.func @transform_3(%arg0: i32) -> (i32, i32) {
    %c0_i32 = arith.constant 0 : i32
    %c0_i32_0 = arith.constant 0 : i32
    return %c0_i32, %arg0 : i32, i32
  }
}

</mosaic_0001>

<bundles_post_ra>
// kernel: relative_position_2d_encoder.1
= control target key start
LH: loop header
LB: loop body
LE: loop exit
PB: predicated region body
PF: predicated region fallthrough
CT: control target
= control target key end

     0   :  { %v31_v0 = vlaneseq  ;;  %v917_v1 = vmov 0.0   ;;  %vm88_vm0 = vcmask 523264   ;;  %v918_v22 = vmov 1.0|1.0   ;;  %s1260_s2 = inlined_call_operand.vmem [shape: s32[1,256], index: 2, kind: input, shape index: {}]   ;;  %s1261_s1 = inlined_call_operand.vmem [shape: s32[64,256], index: 1, kind: input, shape index: {}]   ;;  %s1262_s0 = inlined_call_operand.vmem [shape: f32[8,64], index: 0, kind: input, shape index: {}]   ;;  %s1263_s3 = inlined_call_operand.vmem [shape: f32[8,256], index: 3, kind: output, shape index: {}]  }
   0x1   :  { %172 = vmatprep.mubr.f32.mxu1 %v917_v1  ;;  %521 = vmatprep.mubr.f32.mxu0 %v917_v1  ;;  %v30_v3 = vld [vmem:[%s1260_s2] sm:$0x3]  ;;  %v15_v4 = vld [vmem:[%s1261_s1 + $0x8] sm:$0xff]  ;;  %v17_v7 = vld [vmem:[%s1261_s1 + $0x18] sm:$0xff] }
   0x2   :  { %v32_v2 = vshrl.u32 %v31_v0, 7  ;;  %v14_v8 = vld [vmem:[%s1261_s1] sm:$0xff]  ;;  %v16_v9 = vld [vmem:[%s1261_s1 + $0x10] sm:$0xff]  ;;  %v19_v14 = vld [vmem:[%s1261_s1 + $0x28] sm:$0xff] }
   0x3   :  { %v87_v12 = vld [vmem:[%s1262_s0] sm:$0xff]  ;;  %v21_v15 = vld [vmem:[%s1261_s1 + $0x38] sm:$0xff]  ;;  %v20_v27 = vld [vmem:[%s1261_s1 + $0x30] sm:$0xff] }
   0x4   :  { %v37_v5 = vsub.s32 1, %v32_v2  ;;  %v33_v6 = vsub.s32 0, %v32_v2  ;;  %v963_v13 = vsel %vm88_vm0, %v87_v12, 0  ;;  %v18_v21 = vld [vmem:[%s1261_s1 + $0x20] sm:$0xff]  ;;  %v23_v29 = vld [vmem:[%s1261_s1 + $0x48] sm:$0xff]  ;;  %v25_v38 = vld [vmem:[%s1261_s1 + $0x58] sm:$0xff] }
   0x5   :  { %v1023_v30 = vand.u32 4294901760, %v963_v13  ;;  %v22_v39 = vld [vmem:[%s1261_s1 + $0x40] sm:$0xff]  ;;  %v24_v48 = vld [vmem:[%s1261_s1 + $0x50] sm:$0xff]  ;;  %v27_v49 = vld [vmem:[%s1261_s1 + $0x68] sm:$0xff] }
   0x6   :  { %v956_v10 = vrot.slane %v30_v3, %v37_v5  ;;  %v958_v11 = vrot.slane %v30_v3, %v33_v6  ;;  %v29_v52 = vld [vmem:[%s1261_s1 + $0x78] sm:$0xff]  ;;  %v26_v58 = vld [vmem:[%s1261_s1 + $0x60] sm:$0xff]  ;;  %v28_v61 = vld [vmem:[%s1261_s1 + $0x70] sm:$0xff] }
   0x8   :  { %vm40_vm1 = vcmp.eq.s32.totalorder %v15_v4, %v956_v10  ;;  %vm42_vm2 = vcmp.eq.s32.totalorder %v17_v7, %v956_v10  ;;  %vm39_vm3 = vcmp.eq.s32.totalorder %v14_v8, %v958_v11  ;;  %vm41_vm4 = vcmp.eq.s32.totalorder %v16_v9, %v958_v11 }
   0x9   :  { %v746_v16 = vsel %vm40_vm1, 1.0, %v917_v1  ;;  %v748_v17 = vsel %vm42_vm2, 1.0, %v917_v1  ;;  %vm977_vm5 = vmpackc.low %vm42_vm2, %vm40_vm1  ;;  %v745_v19 = vsel %vm39_vm3, 1.0, %v917_v1  ;;  %v747_v20 = vsel %vm41_vm4, 1.0, %v917_v1 }
   0xa   :  { %810 = vmatprep.subr.msk.bf16.mxu1 %vm977_vm5, %v918_v22  ;;  %v991_v23 = vsub.f32 %v746_v16, %v746_v16  ;;  %v993_v24 = vsub.f32 %v748_v17, %v748_v17  ;;  %858 = vmatprep.subr.msk.bf16.mxu0 %vm977_vm5, %v918_v22  ;;  %vm1000_vm6 = vmpackc.low %vm41_vm4, %vm39_vm3  ;;  %v1004_v26 = vsub.f32 %v745_v19, %v745_v19 }
   0xb   :  { %812 = vmatpush1.bf16.msk.msra.mxu1 %vm1000_vm6, %v918_v22  ;;  %v1012_v28 = vsub.f32 %v747_v20, %v747_v20  ;;  %860 = vmatpush1.bf16.msk.msra.mxu0 %vm1000_vm6, %v918_v22  ;;  %vm44_vm7 = vcmp.eq.s32.totalorder %v19_v14, %v956_v10  ;;  %vm46_vm8 = vcmp.eq.s32.totalorder %v21_v15, %v956_v10 }
   0xc   :  { %v192_v31 = vand.u32 4294901760, %v1004_v26  ;;  %v750_v32 = vsel %vm44_vm7, 1.0, %v917_v1  ;;  %v752_v33 = vsel %vm46_vm8, 1.0, %v917_v1  ;;  %vm1028_vm9 = vmpackc.low %vm46_vm8, %vm44_vm7  ;;  %vm43_vm10 = vcmp.eq.s32.totalorder %v18_v21, %v958_v11 }
   0xd   :  { %v204_v35 = vand.u32 4294901760, %v1012_v28  ;;  %814 = vmatprep.subr.msk.bf16.mxu1 %vm1028_vm9, %v918_v22  ;;  %v1037_v36 = vsub.f32 %v750_v32, %v750_v32  ;;  %v1039_v37 = vsub.f32 %v752_v33, %v752_v33  ;;  %862 = vmatprep.subr.msk.bf16.mxu0 %vm1028_vm9, %v918_v22  ;;  %vm45_vm11 = vcmp.eq.s32.totalorder %v20_v27, %v958_v11 }
   0xe   :  { %v193_v40 = vsub.f32 %v1004_v26, %v192_v31  ;;  %v749_v41 = vsel %vm43_vm10, 1.0, %v917_v1  ;;  %v751_v42 = vsel %vm45_vm11, 1.0, %v917_v1  ;;  %vm1056_vm12 = vmpackc.low %vm45_vm11, %vm43_vm10  ;;  %vm48_vm13 = vcmp.eq.s32.totalorder %v23_v29, %v956_v10 }
   0xf   :  { %v205_v44 = vsub.f32 %v1012_v28, %v204_v35  ;;  %816 = vmatpush1.bf16.msk.msra.mxu1 %vm1056_vm12, %v918_v22  ;;  %v1067_v45 = vsub.f32 %v749_v41, %v749_v41  ;;  %v1069_v46 = vsub.f32 %v751_v42, %v751_v42  ;;  %864 = vmatpush1.bf16.msk.msra.mxu0 %vm1056_vm12, %v918_v22  ;;  %v754_v47 = vsel %vm48_vm13, 1.0, %v917_v1 }
  0x10   :  { %v194_v50 = vand.u32 4294901760, %v193_v40  ;;  %vm50_vm14 = vcmp.eq.s32.totalorder %v25_v38, %v956_v10  ;;  %v1084_v51 = vsub.f32 %v754_v47, %v754_v47  ;;  %vm47_vm15 = vcmp.eq.s32.totalorder %v22_v39, %v958_v11 }
  0x11   :  { %v206_v53 = vand.u32 4294901760, %v205_v44  ;;  %v216_v54 = vand.u32 4294901760, %v1067_v45  ;;  %v228_v55 = vand.u32 4294901760, %v1069_v46  ;;  %v756_v56 = vsel %vm50_vm14, 1.0, %v917_v1  ;;  %vm1095_vm0 = vmpackc.low %vm50_vm14, %vm48_vm13 }
  0x12   :  { %818 = vmatprep.subr.msk.bf16.mxu1 %vm1095_vm0, %v918_v22  ;;  %v1105_v59 = vsub.f32 %v756_v56, %v756_v56  ;;  %866 = vmatprep.subr.msk.bf16.mxu0 %vm1095_vm0, %v918_v22  ;;  %vm49_vm1 = vcmp.eq.s32.totalorder %v24_v48, %v958_v11  ;;  %v753_v60 = vsel %vm47_vm15, 1.0, %v917_v1  ;;  %vm52_vm2 = vcmp.eq.s32.totalorder %v27_v49, %v956_v10 }
  0x13   :  { %v755_v62 = vsel %vm49_vm1, 1.0, %v917_v1  ;;  %vm1121_vm3 = vmpackc.low %vm49_vm1, %vm47_vm15  ;;  %v1125_v0 = vsub.f32 %v753_v60, %v753_v60  ;;  %vm54_vm4 = vcmp.eq.s32.totalorder %v29_v52, %v956_v10  ;;  %v758_v2 = vsel %vm52_vm2, 1.0, %v917_v1 }
  0x14   :  { %820 = vmatpush1.bf16.msk.msra.mxu1 %vm1121_vm3, %v918_v22  ;;  %v1132_v3 = vsub.f32 %v755_v62, %v755_v62  ;;  %868 = vmatpush1.bf16.msk.msra.mxu0 %vm1121_vm3, %v918_v22  ;;  %v760_v4 = vsel %vm54_vm4, 1.0, %v917_v1  ;;  %vm1138_vm7 = vmpackc.low %vm54_vm4, %vm52_vm2  ;;  %v1142_v6 = vsub.f32 %v758_v2, %v758_v2  ;;  %vm51_vm8 = vcmp.eq.s32.totalorder %v26_v58, %v958_v11 }
  0x15   :  { %v240_v7 = vand.u32 4294901760, %v1125_v0  ;;  %822 = vmatprep.subr.msk.bf16.mxu1 %vm1138_vm7, %v918_v22  ;;  %v1149_v8 = vsub.f32 %v760_v4, %v760_v4  ;;  %870 = vmatprep.subr.msk.bf16.mxu0 %vm1138_vm7, %v918_v22  ;;  %vm53_vm10 = vcmp.eq.s32.totalorder %v28_v61, %v958_v11  ;;  %v757_v9 = vsel %vm51_vm8, 1.0, %v917_v1 }
  0x16   :  { %v252_v10 = vand.u32 4294901760, %v1132_v3  ;;  %v759_v12 = vsel %vm53_vm10, 1.0, %v917_v1  ;;  %vm1158_vm11 = vmpackc.low %vm53_vm10, %vm51_vm8  ;;  %v1162_v15 = vsub.f32 %v757_v9, %v757_v9  ;;  %v186_v16 = vand.u32 4294901760, %v991_v23 }
  0x17   :  { %v1165_v17 = vsub.f32 %v759_v12, %v759_v12  ;;  %v198_v19 = vand.u32 4294901760, %v993_v24  ;;  %v1170_v11 = vsub.f32 %v963_v13, %v1023_v30  ;;  %v827_v20 = vpack.c.bf16 %v206_v53, %v194_v50 }
  0x18   :  { %824 = vmatpush1.bf16.msk.msra.mxu1 %vm1158_vm11, %v918_v22  ;;  %v264_v21 = vand.u32 4294901760, %v1162_v15  ;;  %872 = vmatpush1.bf16.msk.msra.mxu0 %vm1158_vm11, %v918_v22  ;;  %v187_v27 = vsub.f32 %v991_v23, %v186_v16  ;;  %v875_v29 = vpack.c.bf16 %v204_v35, %v192_v31  ;;  %v210_v13 = vand.u32 4294901760, %v1037_v36 }
  0x19   :  { %v276_v32 = vand.u32 4294901760, %v1165_v17  ;;  %v199_v33 = vsub.f32 %v993_v24, %v198_v19  ;;  %v873_v38 = vpack.c.bf16 %v198_v19, %v186_v16  ;;  %v175_v39 = vand.u32 4294901760, %v1170_v11 }
  0x1a   :  { %v188_v40 = vand.u32 4294901760, %v187_v27  ;;  %v211_v41 = vsub.f32 %v1037_v36, %v210_v13  ;;  %v222_v42 = vand.u32 4294901760, %v1039_v37  ;;  %v217_v44 = vsub.f32 %v1067_v45, %v216_v54 }
  0x1b   :  { %v200_v47 = vand.u32 4294901760, %v199_v33  ;;  %874 = vmatprep.subr.bf16.mxu0 %v873_v38  ;;  %v176_v31 = vsub.f32 %v1170_v11, %v175_v39  ;;  %525 = vmatmul.mubr.f32.vlgmr.msra.gmra.mrb[0].mxu0 %v175_v39  ;;  %v229_v35 = vsub.f32 %v1069_v46, %v228_v55  ;;  %v879_v48 = vpack.c.bf16 %v228_v55, %v216_v54 }
  0x1c   :  { %876 = vmatpush1.bf16.msra.mxu0 %v875_v29  ;;  %v212_v49 = vand.u32 4294901760, %v211_v41  ;;  %v223_v50 = vsub.f32 %v1039_v37, %v222_v42  ;;  %v877_v52 = vpack.c.bf16 %v222_v42, %v210_v13  ;;  %v218_v53 = vand.u32 4294901760, %v217_v44  ;;  %643 = vmatprep.mubr.f32.mxu0 %v917_v1 }
  0x1d   :  { %v825_v56 = vpack.c.bf16 %v200_v47, %v188_v40  ;;  %v177_v58 = vand.u32 4294901760, %v176_v31  ;;  %v230_v60 = vand.u32 4294901760, %v229_v35  ;;  %v234_v61 = vand.u32 4294901760, %v1084_v51 }
  0x1e   :  { %v224_v62 = vand.u32 4294901760, %v223_v50  ;;  %878 = vmatprep.subr.bf16.mxu0 %v877_v52  ;;  %v246_v2 = vand.u32 4294901760, %v1105_v59  ;;  %v241_v4 = vsub.f32 %v1125_v0, %v240_v7  ;;  %v253_v54 = vsub.f32 %v1132_v3, %v252_v10 }
  0x1f   :  { %826 = vmatprep.subr.bf16.mxu1 %v825_v56  ;;  %178 = vmatmul.mubr.f32.vlgmr.msra.gmra.mrb[0].mxu1 %v177_v58  ;;  %v831_v55 = vpack.c.bf16 %v230_v60, %v218_v53  ;;  %v235_v9 = vsub.f32 %v1084_v51, %v234_v61  ;;  %v883_v12 = vpack.c.bf16 %v252_v10, %v240_v7  ;;  %v258_v16 = vand.u32 4294901760, %v1142_v6 }
  0x20   :  { %828 = vmatpush1.bf16.msra.mxu1 %v827_v20  ;;  %v829_v19 = vpack.c.bf16 %v224_v62, %v212_v49  ;;  %880 = vmatpush1.bf16.msra.mxu0 %v879_v48  ;;  %v247_v27 = vsub.f32 %v1105_v59, %v246_v2  ;;  %v881_v29 = vpack.c.bf16 %v246_v2, %v234_v61  ;;  %v242_v13 = vand.u32 4294901760, %v241_v4 }
  0x21   :  { %v236_v33 = vand.u32 4294901760, %v235_v9  ;;  %v254_v38 = vand.u32 4294901760, %v253_v54  ;;  %v259_v39 = vsub.f32 %v1142_v6, %v258_v16  ;;  %v270_v40 = vand.u32 4294901760, %v1149_v8  ;;  %328 = vmatprep.mubr.f32.mxu1 %v917_v1 }
  0x22   :  { %830 = vmatprep.subr.bf16.mxu1 %v829_v19  ;;  %v248_v41 = vand.u32 4294901760, %v247_v27  ;;  %882 = vmatprep.subr.bf16.mxu0 %v881_v29  ;;  %v265_v7 = vsub.f32 %v1162_v15, %v264_v21  ;;  %v277_v10 = vsub.f32 %v1165_v17, %v276_v32  ;;  %v887_v47 = vpack.c.bf16 %v276_v32, %v264_v21 }
  0x23   :  { %v260_v20 = vand.u32 4294901760, %v259_v39  ;;  %v271_v42 = vsub.f32 %v1149_v8, %v270_v40  ;;  %v885_v44 = vpack.c.bf16 %v270_v40, %v258_v16  ;;  %v835_v35 = vpack.c.bf16 %v254_v38, %v242_v13 }
  0x24   :  { %832 = vmatpush1.bf16.msra.mxu1 %v831_v55  ;;  %v833_v31 = vpack.c.bf16 %v248_v41, %v236_v33  ;;  %884 = vmatpush1.bf16.msra.mxu0 %v883_v12  ;;  %v266_v48 = vand.u32 4294901760, %v265_v7  ;;  %v278_v49 = vand.u32 4294901760, %v277_v10  ;;  %v841_v56 = vpack.c.bf16 %v993_v24, %v991_v23 }
  0x25   :  { %v272_v50 = vand.u32 4294901760, %v271_v42  ;;  %886 = vmatprep.subr.bf16.mxu0 %v885_v44  ;;  %v843_v21 = vpack.c.bf16 %v1012_v28, %v1004_v26  ;;  %v845_v32 = vpack.c.bf16 %v1039_v37, %v1037_v36  ;;  %v847_v18 = vpack.c.bf16 %v1069_v46, %v1067_v45 }
  0x26   :  { %834 = vmatprep.subr.bf16.mxu1 %v833_v31  ;;  %v839_v53 = vpack.c.bf16 %v278_v49, %v266_v48  ;;  %v849_v23 = vpack.c.bf16 %v1105_v59, %v1084_v51  ;;  %v851_v24 = vpack.c.bf16 %v1132_v3, %v1125_v0  ;;  %v853_v25 = vpack.c.bf16 %v1149_v8, %v1142_v6 }
  0x27   :  { %v837_v52 = vpack.c.bf16 %v272_v50, %v260_v20 }
  0x28   :  { %836 = vmatpush1.bf16.msra.mxu1 %v835_v35  ;;  %888 = vmatpush1.bf16.msra.mxu0 %v887_v47 }
  0x29   :  { %838 = vmatprep.subr.bf16.mxu1 %v837_v52  ;;  %890 = vmatprep.subr.msk.bf16.mxu0 %vm977_vm5, %v918_v22 }
  0x2b   :  { %645 = vmatmul.mubr.f32.vlgmr.msra.gmra.mrb[0].mxu0 %v1023_v30 }
  0x2c   :  { %840 = vmatpush1.bf16.msra.mxu1 %v839_v53  ;;  %892 = vmatpush1.bf16.msk.msra.mxu0 %vm1000_vm6, %v918_v22 }
  0x2d   :  { %842 = vmatprep.subr.bf16.mxu1 %v841_v56  ;;  %894 = vmatprep.subr.msk.bf16.mxu0 %vm1028_vm9, %v918_v22 }
  0x2e   :  { %731 = vmatprep.mubr.f32.mxu0 %v917_v1 }
  0x2f   :  { %330 = vmatmul.mubr.f32.vlgmr.msra.gmra.mrb[0].mxu1 %v1023_v30 }
  0x30   :  { %844 = vmatpush1.bf16.msra.mxu1 %v843_v21  ;;  %896 = vmatpush1.bf16.msk.msra.mxu0 %vm1056_vm12, %v918_v22 }
  0x31   :  { %846 = vmatprep.subr.bf16.mxu1 %v845_v32  ;;  %898 = vmatprep.subr.msk.bf16.mxu0 %vm1095_vm0, %v918_v22 }
  0x32   :  { %432 = vmatprep.mubr.f32.mxu1 %v917_v1  ;;  %v855_v1 = vpack.c.bf16 %v1165_v17, %v1162_v15 }
  0x34   :  { %848 = vmatpush1.bf16.msra.mxu1 %v847_v18  ;;  %900 = vmatpush1.bf16.msk.msra.mxu0 %vm1121_vm3, %v918_v22 }
  0x35   :  { %850 = vmatprep.subr.bf16.mxu1 %v849_v23  ;;  %902 = vmatprep.subr.msk.bf16.mxu0 %vm1138_vm7, %v918_v22 }
  0x38   :  { %852 = vmatpush1.bf16.msra.mxu1 %v851_v24  ;;  %904 = vmatpush1.bf16.msk.msra.mxu0 %vm1158_vm11, %v918_v22 }
  0x39   :  { %854 = vmatprep.subr.bf16.mxu1 %v853_v25 }
  0x3b   :  { %733 = vmatmul.mubr.f32.vlgmr.msra.gmra.mrb[0].mxu0 %v1023_v30 }
  0x3c   :  { %856 = vmatpush1.bf16.msra.mxu1 %v855_v1 }
  0x3f   :  { %435 = vmatmul.mubr.f32.vlgmr.msra.gmra.mrb[0].mxu1 %v1170_v11 }
 0x10e   :  { %v734_v26 = vpop.f32.mrb[0].mxu0 }
 0x10f   :  { %v736_v28 = vpop.f32.mrb[1].mxu0 }
 0x112   :  { %v436_v34 = vpop.f32.mrb[0].mxu1 }
 0x113   :  { %v905_v36 = vadd.f32 %v734_v26, %v436_v34  ;;  %v438_v37 = vpop.f32.mrb[1].mxu1 }
 0x114   :  { %v906_v43 = vadd.f32 %v736_v28, %v438_v37 }
 0x115   :  { %739 = vst [vmem:[%s1263_s3] sm:$0xff] %v905_v36 }
 0x116   :  { %740 = vst [vmem:[%s1263_s3 + $0x8] sm:$0xff] %v906_v43 }

</bundles_post_ra>
